<compile_context>
chip_gen: v5e
topology: v5e:2x2
jax: 0.10.0
libtpu: 0.0.40
codegen_flags: <defaults>
</compile_context>

<pallas_src>
import functools

import jax
import jax.numpy as jnp
from jax import lax
from jax.experimental import pallas as pl
from jax.experimental.pallas import tpu as pltpu

EPS = 1e-5


# --------------------------------------------------------------------------------------
# kernels (all tensors are channels-first flattened: (C, M), M on the lane axis)
# --------------------------------------------------------------------------------------
def _write_stats(st_ref, y):
    # per-tile, per-channel [sum, sum-of-squares] -> (1, C, 2) output block (f32).
    # Kept in the sublane-natural (C, 2) layout: the lane-axis reduction result already
    # lives on sublanes, so no relayout is needed; the masked 2-lane store is tiny.
    st_ref[0, :, 0:1] = jnp.sum(y, axis=1, keepdims=True)
    st_ref[0, :, 1:2] = jnp.sum(y * y, axis=1, keepdims=True)


def _conv_stats_kernel_convskip(cin, p_ref, w1_ref, ws_ref, y_ref, s_ref, st1_ref, sts_ref):
    # (Cout, 9*Cin) @ (9*Cin, TM) 3x3 conv (im2col) plus a separate small 1x1 skip matmul
    # on the centre-tap rows (tap 4 == strided x), both accumulated in f32.
    y = jnp.dot(w1_ref[...], p_ref[...], preferred_element_type=jnp.float32)
    s = jnp.dot(ws_ref[...], p_ref[4 * cin:5 * cin, :], preferred_element_type=jnp.float32)
    y_ref[...] = y.astype(y_ref.dtype)
    s_ref[...] = s.astype(s_ref.dtype)
    _write_stats(st1_ref, y)
    _write_stats(sts_ref, s)


def _conv_stats_kernel_identity(p_ref, w1_ref, y_ref, st_ref):
    y = jnp.dot(w1_ref[...], p_ref[...], preferred_element_type=jnp.float32)
    y_ref[...] = y.astype(y_ref.dtype)
    _write_stats(st_ref, y)


def _bn_relu_conv_stats_kernel(tm, m_true, needs_mask, compute_dtype,
                               y1_ref, w2_ref, sc_ref, sh_ref, y2_ref, st_ref):
    # BN1 (precomputed affine) -> ReLU -> 1x1 conv, plus per-tile BN2 statistics.
    a = jnp.maximum(y1_ref[...] * sc_ref[...] + sh_ref[...], 0.0)
    if needs_mask:  # zero the zero-padded M columns so they don't pollute BN2 statistics
        col = pl.program_id(0) * tm + lax.broadcasted_iota(jnp.int32, (1, tm), 1)
        a = jnp.where(col < m_true, a, 0.0)
    y2 = jnp.dot(w2_ref[...], a.astype(compute_dtype), preferred_element_type=jnp.float32)
    y2_ref[...] = y2.astype(y2_ref.dtype)
    _write_stats(st_ref, y2)


def _out_kernel_convskip(y2_ref, s_ref, sc2_ref, sh2_ref, scs_ref, shs_ref, o_ref):
    o = (y2_ref[...] * sc2_ref[...] + sh2_ref[...]
         + s_ref[...] * scs_ref[...] + shs_ref[...])
    o_ref[...] = jnp.maximum(o, 0.0).astype(o_ref.dtype)


def _out_kernel_identity(y2_ref, s_ref, sc2_ref, sh2_ref, o_ref):
    o = y2_ref[...] * sc2_ref[...] + sh2_ref[...] + s_ref[...]
    o_ref[...] = jnp.maximum(o, 0.0).astype(o_ref.dtype)


# --------------------------------------------------------------------------------------
# wrapper helpers
# --------------------------------------------------------------------------------------
def _bn_affine(sums, sumsqs, count, gamma, beta):
    # training-mode BatchNorm: biased variance over the batch, eps=1e-5, folded to y*sc+sh
    mean = sums / count
    var = jnp.maximum(sumsqs / count - mean * mean, 0.0)
    scale = gamma * lax.rsqrt(var + EPS)
    shift = beta - mean * scale
    return (scale.reshape(-1, 1).astype(jnp.float32),
            shift.reshape(-1, 1).astype(jnp.float32))


_VMEM_LIMIT_CACHE = None


def _vmem_limit_bytes():
    # 3/4 of physical VMEM, capped at 96 MiB: 48 MiB on v7x (64 MiB/TC), 96 MiB on v5e/v6e.
    global _VMEM_LIMIT_CACHE
    if _VMEM_LIMIT_CACHE is None:
        cap = 64 * 1024 * 1024                       # conservative default (v7x per-TC VMEM)
        try:
            cap = int(pltpu.get_tpu_info().vmem_capacity_bytes)
        except Exception:
            pass
        _VMEM_LIMIT_CACHE = max(32 << 20, min(cap * 3 // 4, 96 << 20))
    return _VMEM_LIMIT_CACHE


def _pick_tm(m_pad, per_col_bytes, vmem_limit):
    # Largest lane tile that (a) divides m_pad, (b) keeps the double-buffered per-tile
    # working set comfortably inside the VMEM limit and (c) leaves >= 2 grid steps so the
    # "parallel" axis can be split across both v7x TensorCores.
    for tm in (2048, 1024, 512, 256, 128):
        if m_pad % tm:
            continue
        if 2 * tm * per_col_bytes > vmem_limit // 3:
            continue
        if m_pad // tm < 2 and m_pad > 128:
            continue
        return tm
    return 128


@functools.partial(jax.jit,
                   static_argnames=("in_channels", "out_channels", "stride", "compute_dtype"))
def resblock_forward(x_nchw, params, *, in_channels, out_channels, stride=None,
                     compute_dtype=jnp.bfloat16):
    stride = stride or (1 if in_channels >= out_channels else 2)
    skip_is_conv = not (stride == 1 and in_channels == out_channels)

    N, C, H, W = x_nchw.shape
    assert C == in_channels
    Cout = out_channels
    Ho = (H + 2 - 3) // stride + 1
    Wo = (W + 2 - 3) // stride + 1
    M = N * Ho * Wo

    # --- glue: transposed im2col (9*Cin, M), built directly in compute dtype ------------
    # TODO(synk): assemble these 9 taps in-kernel from a haloed input tile instead.
    x = x_nchw.astype(compute_dtype)
    xp = jnp.pad(x, ((0, 0), (0, 0), (1, 1), (1, 1)))
    taps = [xp[:, :, kh:kh + stride * (Ho - 1) + 1:stride,
                     kw:kw + stride * (Wo - 1) + 1:stride]
            for kh in range(3) for kw in range(3)]
    patches_t = (jnp.stack(taps, axis=0)          # (9, N, Cin, Ho, Wo)
                 .transpose(0, 2, 1, 3, 4)        # (9, Cin, N, Ho, Wo)
                 .reshape(9 * C, M))

    # --- lane-dense M tiling (per-pass tile sizes, VMEM-budget aware) --------------------
    m_pad = ((M + 127) // 128) * 128
    patches_t = jnp.pad(patches_t, ((0, 0), (0, m_pad - M)))

    cb = jnp.dtype(compute_dtype).itemsize
    vmem_limit = _vmem_limit_bytes()
    tm1 = _pick_tm(m_pad, (9 * C + 2 * Cout) * cb, vmem_limit)      # pass 1 working set
    tm23 = _pick_tm(m_pad, Cout * (3 * cb + 4), vmem_limit)         # passes 2/3 working set
    n1, n23 = m_pad // tm1, m_pad // tm23

    cparams = pltpu.CompilerParams(dimension_semantics=("parallel",),
                                   vmem_limit_bytes=vmem_limit)
    big = lambda c, tm: pl.BlockSpec((c, tm), lambda t: (0, t))
    full = lambda r, c: pl.BlockSpec((r, c), lambda t: (0, 0))
    par = pl.BlockSpec((Cout, 1), lambda t: (0, 0))
    stat_spec = pl.BlockSpec((1, Cout, 2), lambda t: (t, 0, 0))

    w1m = params["w1"].transpose(0, 2, 3, 1).reshape(Cout, 9 * C).astype(compute_dtype)

    # --- pass 1: conv3x3 matmul (+ small 1x1 skip matmul), per-tile BN sum/sumsq ---------
    if skip_is_conv:
        wsm = params["ws"][:, :, 0, 0].astype(compute_dtype)        # (Cout, Cin)
        y1, s_lin, st1, sts = pl.pallas_call(
            functools.partial(_conv_stats_kernel_convskip, C),
            grid=(n1,),
            in_specs=[big(9 * C, tm1), full(Cout, 9 * C), full(Cout, C)],
            out_specs=(big(Cout, tm1), big(Cout, tm1), stat_spec, stat_spec),
            out_shape=(jax.ShapeDtypeStruct((Cout, m_pad), compute_dtype),
                       jax.ShapeDtypeStruct((Cout, m_pad), compute_dtype),
                       jax.ShapeDtypeStruct((n1, Cout, 2), jnp.float32),
                       jax.ShapeDtypeStruct((n1, Cout, 2), jnp.float32)),
            compiler_params=cparams,
        )(patches_t, w1m, wsm)
        sts = jnp.sum(sts, axis=0)                                  # (Cout, 2) global sums
    else:
        y1, st1 = pl.pallas_call(
            _conv_stats_kernel_identity,
            grid=(n1,),
            in_specs=[big(9 * C, tm1), full(Cout, 9 * C)],
            out_specs=(big(Cout, tm1), stat_spec),
            out_shape=(jax.ShapeDtypeStruct((Cout, m_pad), compute_dtype),
                       jax.ShapeDtypeStruct((n1, Cout, 2), jnp.float32)),
            compiler_params=cparams,
        )(patches_t, w1m)

    st1 = jnp.sum(st1, axis=0)                                      # (Cout, 2) global sums
    sc1, sh1 = _bn_affine(st1[:, 0], st1[:, 1], M, params["g1"], params["b1"])

    # --- pass 2: BN1 + ReLU + 1x1 conv, per-tile BN2 sum/sumsq ---------------------------
    w2m = params["w2"][:, :, 0, 0].astype(compute_dtype)            # (Cout, Cout)
    y2, st2 = pl.pallas_call(
        functools.partial(_bn_relu_conv_stats_kernel, tm23, M, m_pad != M, compute_dtype),
        grid=(n23,),
        in_specs=[big(Cout, tm23), full(Cout, Cout), par, par],
        out_specs=(big(Cout, tm23), stat_spec),
        out_shape=(jax.ShapeDtypeStruct((Cout, m_pad), compute_dtype),
                   jax.ShapeDtypeStruct((n23, Cout, 2), jnp.float32)),
        compiler_params=cparams,
    )(y1, w2m, sc1, sh1)

    st2 = jnp.sum(st2, axis=0)
    sc2, sh2 = _bn_affine(st2[:, 0], st2[:, 1], M, params["g2"], params["b2"])

    # --- pass 3: BN2 + skip (+BN) + ReLU -------------------------------------------------
    if skip_is_conv:
        scs, shs = _bn_affine(sts[:, 0], sts[:, 1], M, params["gs"], params["bs"])
        out_t = pl.pallas_call(
            _out_kernel_convskip,
            grid=(n23,),
            in_specs=[big(Cout, tm23), big(Cout, tm23), par, par, par, par],
            out_specs=big(Cout, tm23),
            out_shape=jax.ShapeDtypeStruct((Cout, m_pad), jnp.float32),
            compiler_params=cparams,
        )(y2, s_lin, sc2, sh2, scs, shs)
    else:
        # identity skip == centre-tap rows of patches_t (block row 4), read in place:
        # removes the separate transposed/padded copy of x entirely.
        skip_spec = pl.BlockSpec((Cout, tm23), lambda t: (4, t))
        out_t = pl.pallas_call(
            _out_kernel_identity,
            grid=(n23,),
            in_specs=[big(Cout, tm23), skip_spec, par, par],
            out_specs=big(Cout, tm23),
            out_shape=jax.ShapeDtypeStruct((Cout, m_pad), jnp.float32),
            compiler_params=cparams,
        )(y2, patches_t, sc2, sh2)

    # TODO(synk): this NCHW transpose is wrapper-side XLA glue; return (C, N, Ho, Wo)
    #             directly when the consumer layout allows it.
    return out_t[:, :M].reshape(Cout, N, Ho, Wo).transpose(1, 0, 2, 3)


# --------------------------------------------------------------------------------------
# pure-JAX reference (mirrors the PyTorch forward, training-mode BN)
# --------------------------------------------------------------------------------------
def ref_resblock(x, params, in_channels, out_channels, stride=None):
    stride = stride or (1 if in_channels >= out_channels else 2)
    dn = ("NCHW", "OIHW", "NCHW")

    def bn(y, g, b):
        m = y.mean(axis=(0, 2, 3), keepdims=True)
        v = ((y - m) ** 2).mean(axis=(0, 2, 3), keepdims=True)
        return (y - m) / jnp.sqrt(v + EPS) * g.reshape(1, -1, 1, 1) + b.reshape(1, -1, 1, 1)

    y = lax.conv_general_dilated(x, params["w1"], (stride, stride),
                                 ((1, 1), (1, 1)), dimension_numbers=dn)
    y = jnp.maximum(bn(y, params["g1"], params["b1"]), 0.0)
    y = lax.conv_general_dilated(y, params["w2"], (1, 1), "VALID", dimension_numbers=dn)
    y = bn(y, params["g2"], params["b2"])
    if stride == 1 and in_channels == out_channels:
        s = x
    else:
        s = lax.conv_general_dilated(x, params["ws"], (stride, stride), "VALID",
                                     dimension_numbers=dn)
        s = bn(s, params["gs"], params["bs"])
    return jnp.maximum(y + s, 0.0)


def _make_params(key, cin, cout):
    ks = jax.random.split(key, 9)
    return {
        "w1": jax.random.normal(ks[0], (cout, cin, 3, 3), jnp.float32) * 0.1,
        "g1": jax.random.uniform(ks[1], (cout,), jnp.float32, 0.5, 1.5),
        "b1": jax.random.normal(ks[2], (cout,), jnp.float32) * 0.1,
        "w2": jax.random.normal(ks[3], (cout, cout, 1, 1), jnp.float32) * 0.1,
        "g2": jax.random.uniform(ks[4], (cout,), jnp.float32, 0.5, 1.5),
        "b2": jax.random.normal(ks[5], (cout,), jnp.float32) * 0.1,
        "ws": jax.random.normal(ks[6], (cout, cin, 1, 1), jnp.float32) * 0.1,
        "gs": jax.random.uniform(ks[7], (cout,), jnp.float32, 0.5, 1.5),
        "bs": jax.random.normal(ks[8], (cout,), jnp.float32) * 0.1,
    }


if __name__ == "__main__":
    key = jax.random.PRNGKey(0)
    k1, k2, k3, kx1, kx2, kx3 = jax.random.split(key, 6)

    # Case A: Cin < Cout -> stride 2, conv+BN skip.  f32 path (tight check) + bf16 MXU path.
    N, Cin, Cout, H, W = 2, 4, 8, 16, 16
    params_a = _make_params(k1, Cin, Cout)
    x_a = jax.random.normal(kx1, (N, Cin, H, W), jnp.float32)
    ref_a = ref_resblock(x_a, params_a, Cin, Cout)

    out_f32 = jax.block_until_ready(
        resblock_forward(x_a, params_a, in_channels=Cin, out_channels=Cout,
                         compute_dtype=jnp.float32))
    assert out_f32.shape == ref_a.shape == (N, Cout, H // 2, W // 2)
    err = float(jnp.max(jnp.abs(out_f32 - ref_a)))
    assert err < 1e-4, err

    out_bf16 = jax.block_until_ready(
        resblock_forward(x_a, params_a, in_channels=Cin, out_channels=Cout,
                         compute_dtype=jnp.bfloat16))
    err = float(jnp.max(jnp.abs(out_bf16 - ref_a)))   # bf16 operands + intermediates -> loose
    assert err < 3e-1, err

    # Case B: Cin == Cout, stride 1 -> identity skip (skip read from patches centre tap).
    Cin_b = Cout_b = 8
    params_b = _make_params(k2, Cin_b, Cout_b)
    x_b = jax.random.normal(kx2, (2, Cin_b, 16, 16), jnp.float32)
    out_b = jax.block_until_ready(
        resblock_forward(x_b, params_b, in_channels=Cin_b, out_channels=Cout_b,
                         compute_dtype=jnp.float32))
    ref_b = ref_resblock(x_b, params_b, Cin_b, Cout_b)
    err = float(jnp.max(jnp.abs(out_b - ref_b)))
    assert err < 1e-4, err

    # Case C: M not a multiple of 128 -> exercises the padded-column mask in pass 2.
    params_c = _make_params(k3, Cin_b, Cout_b)
    x_c = jax.random.normal(kx3, (2, Cin_b, 15, 15), jnp.float32)
    out_c = jax.block_until_ready(
        resblock_forward(x_c, params_c, in_channels=Cin_b, out_channels=Cout_b,
                         compute_dtype=jnp.float32))
    ref_c = ref_resblock(x_c, params_c, Cin_b, Cout_b)
    err = float(jnp.max(jnp.abs(out_c - ref_c)))
    assert err < 1e-4, err

    print("KERNEL_OK")
</pallas_src>

<mosaic_0001>
module attributes {stable_mosaic.version = 11 : i64} {
  func.func @_conv_stats_kernel_convskip(%arg0: i32, %arg1: memref<36x128xf32, #tpu.memory_space<vmem>>, %arg2: memref<8x36xf32, #tpu.memory_space<vmem>>, %arg3: memref<8x4xf32, #tpu.memory_space<vmem>>, %arg4: memref<8x128xf32, #tpu.memory_space<vmem>>, %arg5: memref<8x128xf32, #tpu.memory_space<vmem>>, %arg6: memref<1x8x2xf32, #tpu.memory_space<vmem>>, %arg7: memref<1x8x2xf32, #tpu.memory_space<vmem>>) attributes {dimension_semantics = [#tpu.dimension_semantics<parallel>], iteration_bounds = array<i64: 1>, scalar_prefetch = 0 : i64, scratch_operands = 0 : i64, tpu.core_type = #tpu.core_type<tc>, window_params = [{transform_indices = @transform_0, window_bounds = array<i64: 36, 128>}, {pipeline_mode = #tpu.pipeline_mode<synchronous>, transform_indices = @transform_1, window_bounds = array<i64: 8, 36>}, {pipeline_mode = #tpu.pipeline_mode<synchronous>, transform_indices = @transform_2, window_bounds = array<i64: 8, 4>}, {transform_indices = @transform_3, window_bounds = array<i64: 8, 128>}, {transform_indices = @transform_4, window_bounds = array<i64: 8, 128>}, {transform_indices = @transform_5, window_bounds = array<i64: 1, 8, 2>}, {transform_indices = @transform_6, window_bounds = array<i64: 1, 8, 2>}]} {
    %c0 = arith.constant 0 : index
    %c0_0 = arith.constant 0 : index
    %0 = vector.load %arg2[%c0, %c0_0] : memref<8x36xf32, #tpu.memory_space<vmem>>, vector<8x36xf32>
    %c0_1 = arith.constant 0 : index
    %c0_2 = arith.constant 0 : index
    %1 = vector.load %arg1[%c0_1, %c0_2] : memref<36x128xf32, #tpu.memory_space<vmem>>, vector<36x128xf32>
    %cst = arith.constant dense<0.000000e+00> : vector<8x128xf32>
    %2 = tpu.matmul %0, %1, %cst {dimension_numbers = #tpu.dot_dimension_numbers<[1], [0], [0], [1], [0, 0, 1, 1], [], []>} : vector<8x36xf32>, vector<36x128xf32>, vector<8x128xf32> -> vector<8x128xf32>
    %c0_3 = arith.constant 0 : index
    %c0_4 = arith.constant 0 : index
    %3 = vector.load %arg3[%c0_3, %c0_4] : memref<8x4xf32, #tpu.memory_space<vmem>>, vector<8x4xf32>
    %c16 = arith.constant 16 : index
    %c0_5 = arith.constant 0 : index
    %4 = vector.load %arg1[%c16, %c0_5] : memref<36x128xf32, #tpu.memory_space<vmem>>, vector<4x128xf32>
    %cst_6 = arith.constant dense<0.000000e+00> : vector<8x128xf32>
    %5 = tpu.matmul %3, %4, %cst_6 {dimension_numbers = #tpu.dot_dimension_numbers<[1], [0], [0], [1], [0, 0, 1, 1], [], []>} : vector<8x4xf32>, vector<4x128xf32>, vector<8x128xf32> -> vector<8x128xf32>
    %c0_7 = arith.constant 0 : index
    %c0_8 = arith.constant 0 : index
    %6 = vector.load %arg4[%c0_7, %c0_8] : memref<8x128xf32, #tpu.memory_space<vmem>>, vector<8x128xf32>
    tpu.vector_store %arg4[%c0_7, %c0_8], %2 {strides = array<i32>} : memref<8x128xf32, #tpu.memory_space<vmem>>, vector<8x128xf32>,
    %c0_9 = arith.constant 0 : index
    %c0_10 = arith.constant 0 : index
    %7 = vector.load %arg5[%c0_9, %c0_10] : memref<8x128xf32, #tpu.memory_space<vmem>>, vector<8x128xf32>
    tpu.vector_store %arg5[%c0_9, %c0_10], %5 {strides = array<i32>} : memref<8x128xf32, #tpu.memory_space<vmem>>, vector<8x128xf32>,
    %cst_11 = arith.constant dense<0.000000e+00> : vector<8xf32>
    %8 = vector.multi_reduction <add>, %2, %cst_11 [1] : vector<8x128xf32> to vector<8xf32>
    %9 = vector.shape_cast %8 : vector<8xf32> to vector<8x1xf32>
    %c0_12 = arith.constant 0 : index
    %c0_13 = arith.constant 0 : index
    %c0_14 = arith.constant 0 : index
    %10 = vector.load %arg6[%c0_12, %c0_13, %c0_14] : memref<1x8x2xf32, #tpu.memory_space<vmem>>, vector<1x8x1xf32>
    %11 = vector.shape_cast %10 : vector<1x8x1xf32> to vector<8x1xf32>
    %12 = vector.shape_cast %9 : vector<8x1xf32> to vector<1x8x1xf32>
    tpu.vector_store %arg6[%c0_12, %c0_13, %c0_14], %12 {strides = array<i32>} : memref<1x8x2xf32, #tpu.memory_space<vmem>>, vector<1x8x1xf32>,
    %13 = arith.mulf %2, %2 : vector<8x128xf32>
    %cst_15 = arith.constant dense<0.000000e+00> : vector<8xf32>
    %14 = vector.multi_reduction <add>, %13, %cst_15 [1] : vector<8x128xf32> to vector<8xf32>
    %15 = vector.shape_cast %14 : vector<8xf32> to vector<8x1xf32>
    %c0_16 = arith.constant 0 : index
    %c0_17 = arith.constant 0 : index
    %c1 = arith.constant 1 : index
    %16 = vector.load %arg6[%c0_16, %c0_17, %c1] : memref<1x8x2xf32, #tpu.memory_space<vmem>>, vector<1x8x1xf32>
    %17 = vector.shape_cast %16 : vector<1x8x1xf32> to vector<8x1xf32>
    %18 = vector.shape_cast %15 : vector<8x1xf32> to vector<1x8x1xf32>
    tpu.vector_store %arg6[%c0_16, %c0_17, %c1], %18 {strides = array<i32>} : memref<1x8x2xf32, #tpu.memory_space<vmem>>, vector<1x8x1xf32>,
    %cst_18 = arith.constant dense<0.000000e+00> : vector<8xf32>
    %19 = vector.multi_reduction <add>, %5, %cst_18 [1] : vector<8x128xf32> to vector<8xf32>
    %20 = vector.shape_cast %19 : vector<8xf32> to vector<8x1xf32>
    %c0_19 = arith.constant 0 : index
    %c0_20 = arith.constant 0 : index
    %c0_21 = arith.constant 0 : index
    %21 = vector.load %arg7[%c0_19, %c0_20, %c0_21] : memref<1x8x2xf32, #tpu.memory_space<vmem>>, vector<1x8x1xf32>
    %22 = vector.shape_cast %21 : vector<1x8x1xf32> to vector<8x1xf32>
    %23 = vector.shape_cast %20 : vector<8x1xf32> to vector<1x8x1xf32>
    tpu.vector_store %arg7[%c0_19, %c0_20, %c0_21], %23 {strides = array<i32>} : memref<1x8x2xf32, #tpu.memory_space<vmem>>, vector<1x8x1xf32>,
    %24 = arith.mulf %5, %5 : vector<8x128xf32>
    %cst_22 = arith.constant dense<0.000000e+00> : vector<8xf32>
    %25 = vector.multi_reduction <add>, %24, %cst_22 [1] : vector<8x128xf32> to vector<8xf32>
    %26 = vector.shape_cast %25 : vector<8xf32> to vector<8x1xf32>
    %c0_23 = arith.constant 0 : index
    %c0_24 = arith.constant 0 : index
    %c1_25 = arith.constant 1 : index
    %27 = vector.load %arg7[%c0_23, %c0_24, %c1_25] : memref<1x8x2xf32, #tpu.memory_space<vmem>>, vector<1x8x1xf32>
    %28 = vector.shape_cast %27 : vector<1x8x1xf32> to vector<8x1xf32>
    %29 = vector.shape_cast %26 : vector<8x1xf32> to vector<1x8x1xf32>
    tpu.vector_store %arg7[%c0_23, %c0_24, %c1_25], %29 {strides = array<i32>} : memref<1x8x2xf32, #tpu.memory_space<vmem>>, vector<1x8x1xf32>,
    return
  }
  func.func @transform_0(%arg0: i32) -> (i32, i32) {
    %c0_i32 = arith.constant 0 : i32
    %c0_i32_0 = arith.constant 0 : i32
    return %c0_i32, %arg0 : i32, i32
  }
  func.func @transform_1(%arg0: i32) -> (i32, i32) {
    %c0_i32 = arith.constant 0 : i32
    %c0_i32_0 = arith.constant 0 : i32
    %c0_i32_1 = arith.constant 0 : i32
    return %c0_i32, %c0_i32_0 : i32, i32
  }
  func.func @transform_2(%arg0: i32) -> (i32, i32) {
    %c0_i32 = arith.constant 0 : i32
    %c0_i32_0 = arith.constant 0 : i32
    %c0_i32_1 = arith.constant 0 : i32
    return %c0_i32, %c0_i32_0 : i32, i32
  }
  func.func @transform_3(%arg0: i32) -> (i32, i32) {
    %c0_i32 = arith.constant 0 : i32
    %c0_i32_0 = arith.constant 0 : i32
    return %c0_i32, %arg0 : i32, i32
  }
  func.func @transform_4(%arg0: i32) -> (i32, i32) {
    %c0_i32 = arith.constant 0 : i32
    %c0_i32_0 = arith.constant 0 : i32
    return %c0_i32, %arg0 : i32, i32
  }
  func.func @transform_5(%arg0: i32) -> (i32, i32, i32) {
    %c0_i32 = arith.constant 0 : i32
    %c0_i32_0 = arith.constant 0 : i32
    %c0_i32_1 = arith.constant 0 : i32
    return %arg0, %c0_i32, %c0_i32_0 : i32, i32, i32
  }
  func.func @transform_6(%arg0: i32) -> (i32, i32, i32) {
    %c0_i32 = arith.constant 0 : i32
    %c0_i32_0 = arith.constant 0 : i32
    %c0_i32_1 = arith.constant 0 : i32
    return %arg0, %c0_i32, %c0_i32_0 : i32, i32, i32
  }
}

module attributes {stable_mosaic.version = 11 : i64} {
  func.func @_out_kernel_convskip(%arg0: i32, %arg1: memref<8x128xf32, #tpu.memory_space<vmem>>, %arg2: memref<8x128xf32, #tpu.memory_space<vmem>>, %arg3: memref<8x1xf32, #tpu.memory_space<vmem>>, %arg4: memref<8x1xf32, #tpu.memory_space<vmem>>, %arg5: memref<8x1xf32, #tpu.memory_space<vmem>>, %arg6: memref<8x1xf32, #tpu.memory_space<vmem>>, %arg7: memref<8x128xf32, #tpu.memory_space<vmem>>) attributes {dimension_semantics = [#tpu.dimension_semantics<parallel>], iteration_bounds = array<i64: 1>, scalar_prefetch = 0 : i64, scratch_operands = 0 : i64, tpu.core_type = #tpu.core_type<tc>, window_params = [{transform_indices = @transform_0, window_bounds = array<i64: 8, 128>}, {transform_indices = @transform_1, window_bounds = array<i64: 8, 128>}, {pipeline_mode = #tpu.pipeline_mode<synchronous>, transform_indices = @transform_2, window_bounds = array<i64: 8, 1>}, {pipeline_mode = #tpu.pipeline_mode<synchronous>, transform_indices = @transform_3, window_bounds = array<i64: 8, 1>}, {pipeline_mode = #tpu.pipeline_mode<synchronous>, transform_indices = @transform_4, window_bounds = array<i64: 8, 1>}, {pipeline_mode = #tpu.pipeline_mode<synchronous>, transform_indices = @transform_5, window_bounds = array<i64: 8, 1>}, {transform_indices = @transform_6, window_bounds = array<i64: 8, 128>}]} {
    %c0 = arith.constant 0 : index
    %c0_0 = arith.constant 0 : index
    %0 = vector.load %arg1[%c0, %c0_0] : memref<8x128xf32, #tpu.memory_space<vmem>>, vector<8x128xf32>
    %c0_1 = arith.constant 0 : index
    %c0_2 = arith.constant 0 : index
    %1 = vector.load %arg3[%c0_1, %c0_2] : memref<8x1xf32, #tpu.memory_space<vmem>>, vector<8x1xf32>
    %2 = vector.broadcast %1 : vector<8x1xf32> to vector<8x128xf32>
    %3 = arith.mulf %0, %2 : vector<8x128xf32>
    %c0_3 = arith.constant 0 : index
    %c0_4 = arith.constant 0 : index
    %4 = vector.load %arg4[%c0_3, %c0_4] : memref<8x1xf32, #tpu.memory_space<vmem>>, vector<8x1xf32>
    %5 = vector.broadcast %4 : vector<8x1xf32> to vector<8x128xf32>
    %6 = arith.addf %3, %5 : vector<8x128xf32>
    %c0_5 = arith.constant 0 : index
    %c0_6 = arith.constant 0 : index
    %7 = vector.load %arg2[%c0_5, %c0_6] : memref<8x128xf32, #tpu.memory_space<vmem>>, vector<8x128xf32>
    %c0_7 = arith.constant 0 : index
    %c0_8 = arith.constant 0 : index
    %8 = vector.load %arg5[%c0_7, %c0_8] : memref<8x1xf32, #tpu.memory_space<vmem>>, vector<8x1xf32>
    %9 = vector.broadcast %8 : vector<8x1xf32> to vector<8x128xf32>
    %10 = arith.mulf %7, %9 : vector<8x128xf32>
    %11 = arith.addf %6, %10 : vector<8x128xf32>
    %c0_9 = arith.constant 0 : index
    %c0_10 = arith.constant 0 : index
    %12 = vector.load %arg6[%c0_9, %c0_10] : memref<8x1xf32, #tpu.memory_space<vmem>>, vector<8x1xf32>
    %13 = vector.broadcast %12 : vector<8x1xf32> to vector<8x128xf32>
    %14 = arith.addf %11, %13 : vector<8x128xf32>
    %cst = arith.constant 0.000000e+00 : f32
    %15 = vector.broadcast %cst : f32 to vector<8x128xf32>
    %16 = arith.maximumf %14, %15 : vector<8x128xf32>
    %c0_11 = arith.constant 0 : index
    %c0_12 = arith.constant 0 : index
    %17 = vector.load %arg7[%c0_11, %c0_12] : memref<8x128xf32, #tpu.memory_space<vmem>>, vector<8x128xf32>
    tpu.vector_store %arg7[%c0_11, %c0_12], %16 {strides = array<i32>} : memref<8x128xf32, #tpu.memory_space<vmem>>, vector<8x128xf32>,
    return
  }
  func.func @transform_0(%arg0: i32) -> (i32, i32) {
    %c0_i32 = arith.constant 0 : i32
    %c0_i32_0 = arith.constant 0 : i32
    return %c0_i32, %arg0 : i32, i32
  }
  func.func @transform_1(%arg0: i32) -> (i32, i32) {
    %c0_i32 = arith.constant 0 : i32
    %c0_i32_0 = arith.constant 0 : i32
    return %c0_i32, %arg0 : i32, i32
  }
  func.func @transform_2(%arg0: i32) -> (i32, i32) {
    %c0_i32 = arith.constant 0 : i32
    %c0_i32_0 = arith.constant 0 : i32
    %c0_i32_1 = arith.constant 0 : i32
    return %c0_i32, %c0_i32_0 : i32, i32
  }
  func.func @transform_3(%arg0: i32) -> (i32, i32) {
    %c0_i32 = arith.constant 0 : i32
    %c0_i32_0 = arith.constant 0 : i32
    %c0_i32_1 = arith.constant 0 : i32
    return %c0_i32, %c0_i32_0 : i32, i32
  }
  func.func @transform_4(%arg0: i32) -> (i32, i32) {
    %c0_i32 = arith.constant 0 : i32
    %c0_i32_0 = arith.constant 0 : i32
    %c0_i32_1 = arith.constant 0 : i32
    return %c0_i32, %c0_i32_0 : i32, i32
  }
  func.func @transform_5(%arg0: i32) -> (i32, i32) {
    %c0_i32 = arith.constant 0 : i32
    %c0_i32_0 = arith.constant 0 : i32
    %c0_i32_1 = arith.constant 0 : i32
    return %c0_i32, %c0_i32_0 : i32, i32
  }
  func.func @transform_6(%arg0: i32) -> (i32, i32) {
    %c0_i32 = arith.constant 0 : i32
    %c0_i32_0 = arith.constant 0 : i32
    return %c0_i32, %arg0 : i32, i32
  }
}

module attributes {stable_mosaic.version = 11 : i64} {
  func.func @_bn_relu_conv_stats_kernel(%arg0: i32, %arg1: memref<8x128xf32, #tpu.memory_space<vmem>>, %arg2: memref<8x8xf32, #tpu.memory_space<vmem>>, %arg3: memref<8x1xf32, #tpu.memory_space<vmem>>, %arg4: memref<8x1xf32, #tpu.memory_space<vmem>>, %arg5: memref<8x128xf32, #tpu.memory_space<vmem>>, %arg6: memref<1x8x2xf32, #tpu.memory_space<vmem>>) attributes {dimension_semantics = [#tpu.dimension_semantics<parallel>], iteration_bounds = array<i64: 1>, scalar_prefetch = 0 : i64, scratch_operands = 0 : i64, tpu.core_type = #tpu.core_type<tc>, window_params = [{transform_indices = @transform_0, window_bounds = array<i64: 8, 128>}, {pipeline_mode = #tpu.pipeline_mode<synchronous>, transform_indices = @transform_1, window_bounds = array<i64: 8, 8>}, {pipeline_mode = #tpu.pipeline_mode<synchronous>, transform_indices = @transform_2, window_bounds = array<i64: 8, 1>}, {pipeline_mode = #tpu.pipeline_mode<synchronous>, transform_indices = @transform_3, window_bounds = array<i64: 8, 1>}, {transform_indices = @transform_4, window_bounds = array<i64: 8, 128>}, {transform_indices = @transform_5, window_bounds = array<i64: 1, 8, 2>}]} {
    %c0 = arith.constant 0 : index
    %c0_0 = arith.constant 0 : index
    %0 = vector.load %arg1[%c0, %c0_0] : memref<8x128xf32, #tpu.memory_space<vmem>>, vector<8x128xf32>
    %c0_1 = arith.constant 0 : index
    %c0_2 = arith.constant 0 : index
    %1 = vector.load %arg3[%c0_1, %c0_2] : memref<8x1xf32, #tpu.memory_space<vmem>>, vector<8x1xf32>
    %2 = vector.broadcast %1 : vector<8x1xf32> to vector<8x128xf32>
    %3 = arith.mulf %0, %2 : vector<8x128xf32>
    %c0_3 = arith.constant 0 : index
    %c0_4 = arith.constant 0 : index
    %4 = vector.load %arg4[%c0_3, %c0_4] : memref<8x1xf32, #tpu.memory_space<vmem>>, vector<8x1xf32>
    %5 = vector.broadcast %4 : vector<8x1xf32> to vector<8x128xf32>
    %6 = arith.addf %3, %5 : vector<8x128xf32>
    %cst = arith.constant 0.000000e+00 : f32
    %7 = vector.broadcast %cst : f32 to vector<8x128xf32>
    %8 = arith.maximumf %6, %7 : vector<8x128xf32>
    %c0_5 = arith.constant 0 : index
    %c0_6 = arith.constant 0 : index
    %9 = vector.load %arg2[%c0_5, %c0_6] : memref<8x8xf32, #tpu.memory_space<vmem>>, vector<8x8xf32>
    %cst_7 = arith.constant dense<0.000000e+00> : vector<8x128xf32>
    %10 = tpu.matmul %9, %8, %cst_7 {dimension_numbers = #tpu.dot_dimension_numbers<[1], [0], [0], [1], [0, 0, 1, 1], [], []>} : vector<8x8xf32>, vector<8x128xf32>, vector<8x128xf32> -> vector<8x128xf32>
    %c0_8 = arith.constant 0 : index
    %c0_9 = arith.constant 0 : index
    %11 = vector.load %arg5[%c0_8, %c0_9] : memref<8x128xf32, #tpu.memory_space<vmem>>, vector<8x128xf32>
    tpu.vector_store %arg5[%c0_8, %c0_9], %10 {strides = array<i32>} : memref<8x128xf32, #tpu.memory_space<vmem>>, vector<8x128xf32>,
    %cst_10 = arith.constant dense<0.000000e+00> : vector<8xf32>
    %12 = vector.multi_reduction <add>, %10, %cst_10 [1] : vector<8x128xf32> to vector<8xf32>
    %13 = vector.shape_cast %12 : vector<8xf32> to vector<8x1xf32>
    %c0_11 = arith.constant 0 : index
    %c0_12 = arith.constant 0 : index
    %c0_13 = arith.constant 0 : index
    %14 = vector.load %arg6[%c0_11, %c0_12, %c0_13] : memref<1x8x2xf32, #tpu.memory_space<vmem>>, vector<1x8x1xf32>
    %15 = vector.shape_cast %14 : vector<1x8x1xf32> to vector<8x1xf32>
    %16 = vector.shape_cast %13 : vector<8x1xf32> to vector<1x8x1xf32>
    tpu.vector_store %arg6[%c0_11, %c0_12, %c0_13], %16 {strides = array<i32>} : memref<1x8x2xf32, #tpu.memory_space<vmem>>, vector<1x8x1xf32>,
    %17 = arith.mulf %10, %10 : vector<8x128xf32>
    %cst_14 = arith.constant dense<0.000000e+00> : vector<8xf32>
    %18 = vector.multi_reduction <add>, %17, %cst_14 [1] : vector<8x128xf32> to vector<8xf32>
    %19 = vector.shape_cast %18 : vector<8xf32> to vector<8x1xf32>
    %c0_15 = arith.constant 0 : index
    %c0_16 = arith.constant 0 : index
    %c1 = arith.constant 1 : index
    %20 = vector.load %arg6[%c0_15, %c0_16, %c1] : memref<1x8x2xf32, #tpu.memory_space<vmem>>, vector<1x8x1xf32>
    %21 = vector.shape_cast %20 : vector<1x8x1xf32> to vector<8x1xf32>
    %22 = vector.shape_cast %19 : vector<8x1xf32> to vector<1x8x1xf32>
    tpu.vector_store %arg6[%c0_15, %c0_16, %c1], %22 {strides = array<i32>} : memref<1x8x2xf32, #tpu.memory_space<vmem>>, vector<1x8x1xf32>,
    return
  }
  func.func @transform_0(%arg0: i32) -> (i32, i32) {
    %c0_i32 = arith.constant 0 : i32
    %c0_i32_0 = arith.constant 0 : i32
    return %c0_i32, %arg0 : i32, i32
  }
  func.func @transform_1(%arg0: i32) -> (i32, i32) {
    %c0_i32 = arith.constant 0 : i32
    %c0_i32_0 = arith.constant 0 : i32
    %c0_i32_1 = arith.constant 0 : i32
    return %c0_i32, %c0_i32_0 : i32, i32
  }
  func.func @transform_2(%arg0: i32) -> (i32, i32) {
    %c0_i32 = arith.constant 0 : i32
    %c0_i32_0 = arith.constant 0 : i32
    %c0_i32_1 = arith.constant 0 : i32
    return %c0_i32, %c0_i32_0 : i32, i32
  }
  func.func @transform_3(%arg0: i32) -> (i32, i32) {
    %c0_i32 = arith.constant 0 : i32
    %c0_i32_0 = arith.constant 0 : i32
    %c0_i32_1 = arith.constant 0 : i32
    return %c0_i32, %c0_i32_0 : i32, i32
  }
  func.func @transform_4(%arg0: i32) -> (i32, i32) {
    %c0_i32 = arith.constant 0 : i32
    %c0_i32_0 = arith.constant 0 : i32
    return %c0_i32, %arg0 : i32, i32
  }
  func.func @transform_5(%arg0: i32) -> (i32, i32, i32) {
    %c0_i32 = arith.constant 0 : i32
    %c0_i32_0 = arith.constant 0 : i32
    %c0_i32_1 = arith.constant 0 : i32
    return %arg0, %c0_i32, %c0_i32_0 : i32, i32, i32
  }
}

</mosaic_0001>

<bundles_post_ra>
// kernel: resblock_forward.3
= control target key start
LH: loop header
LB: loop body
LE: loop exit
PB: predicated region body
PF: predicated region fallthrough
CT: control target
= control target key end

     0   :  { %vm28_vm0 = vcmask 1043456   ;;  %vm54_vm1 = vcmask 31744   ;;  %vm24_vm2 = vcmask 293888   ;;  %vm85_vm3 = vcmask 7168   ;;  %s196_s0 = inlined_call_operand.vmem [shape: f32[36,128], index: 0, kind: input, shape index: {}]   ;;  %s197_s2 = inlined_call_operand.vmem [shape: f32[8,4], index: 2, kind: input, shape index: {}]   ;;  %s198_s1 = inlined_call_operand.vmem [shape: f32[8,36], index: 1, kind: input, shape index: {}]   ;;  %s199_s4 = inlined_call_operand.vmem [shape: f32[8,128], index: 4, kind: output, shape index: {1}]   ;;  %s200_s3 = inlined_call_operand.vmem [shape: f32[8,128], index: 3, kind: output, shape index: {0}]   ;;  %s201_s5 = inlined_call_operand.vmem [shape: f32[1,8,2], index: 5, kind: output, shape index: {2}]   ;;  %s202_s6 = inlined_call_operand.vmem [shape: f32[1,8,2], index: 6, kind: output, shape index: {3}]  }
   0x1   :  { %v23_v0 = vld [vmem:[%s196_s0 + $0x20] sm:$0xf]  ;;  %v22_v1 = vld [vmem:[%s196_s0 + $0x18] sm:$0xff]  ;;  %v21_v2 = vld [vmem:[%s196_s0 + $0x10] sm:$0xff]  ;;  %vm90_vm4 = vcmask 15368  }
   0x2   :  { %115 = vmatpush.msk.msra.mxu0 %vm28_vm0, %v23_v0  ;;  %v53_v3 = vld [vmem:[%s196_s0 + $0x10] sm:$0xf]  ;;  %v52_v4 = vld [vmem:[%s197_s2] sm:$0xff]  ;;  %v20_v5 = vld [vmem:[%s196_s0 + $0x8] sm:$0xff] }
   0x3   :  { %117 = vmatpush.msk.msra.mxu1 %vm28_vm0, %v53_v3  ;;  %v19_v6 = vld [vmem:[%s196_s0] sm:$0xff] }
   0x4   :  { %44 = vmatpush.msra.mxu0 %v22_v1  ;;  %118 = vmatmul.msk.f32.vlgmr.msra.gmra.mxu1 %vm54_vm1, %v52_v4  ;;  %v18_v7 = vld [vmem:[%s198_s1] sm:$0xff] }
   0x6   :  { %45 = vmatpush.msra.mxu0 %v21_v2 }
   0x8   :  { %46 = vmatpush.msra.mxu0 %v20_v5 }
   0xa   :  { %47 = vmatpush.msra.mxu0 %v19_v6 }
   0xb   :  { %116 = vmatmul.msk.f32.vlgmr.msra.gmra.mxu0 %vm24_vm2, %v18_v7 }
  0x81   :  { %v78_v8 = vpop.f32.mrf.mxu1 }
  0x82   :  { %82 = vst [vmem:[%s199_s4] sm:$0xff] %v78_v8  ;;  %v95_v11 = vmul.f32 %v78_v8, %v78_v8 }
  0x88   :  { %v49_v9 = vpop.f32.mrf.mxu0 }
  0x89   :  { %81 = vst [vmem:[%s200_s3] sm:$0xff] %v49_v9  ;;  %83 = vadd.xlane.f32.xlu0 %v49_v9  ;;  %v87_v10 = vmul.f32 %v49_v9, %v49_v9 }
  0x8b   :  { %88 = vadd.xlane.f32.xlu1 %v87_v10 }
  0x91   :  { %92 = vadd.xlane.f32.xlu0 %v78_v8 }
  0x93   :  { %96 = vadd.xlane.f32.xlu1 %v95_v11 }
  0xfc   :  { %v84_v12 = vpop.xlane.xlu0 %83 }
  0xfd   :  { %86 = vst.msk [vmem:[%s201_s5] sm:$0xff] %vm85_vm3, %v84_v12 }
  0xfe   :  { %v89_v13 = vpop.xlane.xlu1 %88 }
  0xff   :  { %91 = vst.msk [vmem:[%s201_s5] sm:$0xff] %vm90_vm4, %v89_v13 }
 0x104   :  { %v93_v14 = vpop.xlane.xlu0 %92 }
 0x105   :  { %94 = vst.msk [vmem:[%s202_s6] sm:$0xff] %vm85_vm3, %v93_v14 }
 0x106   :  { %v97_v15 = vpop.xlane.xlu1 %96 }
 0x107   :  { %98 = vst.msk [vmem:[%s202_s6] sm:$0xff] %vm90_vm4, %v97_v15 }

// kernel: resblock_forward.5
= control target key start
LH: loop header
LB: loop body
LE: loop exit
PB: predicated region body
PF: predicated region fallthrough
CT: control target
= control target key end

     0   :  { %v63_v0 = vmov 0   ;;  %s120_s4 = inlined_call_operand.vmem [shape: f32[8,1], index: 4, kind: input, shape index: {}]   ;;  %s121_s2 = inlined_call_operand.vmem [shape: f32[8,1], index: 2, kind: input, shape index: {}]   ;;  %s122_s5 = inlined_call_operand.vmem [shape: f32[8,1], index: 5, kind: input, shape index: {}]   ;;  %s123_s3 = inlined_call_operand.vmem [shape: f32[8,1], index: 3, kind: input, shape index: {}]   ;;  %s124_s0 = inlined_call_operand.vmem [shape: f32[8,128], index: 0, kind: input, shape index: {}]   ;;  %s125_s1 = inlined_call_operand.vmem [shape: f32[8,128], index: 1, kind: input, shape index: {}]   ;;  %s126_s6 = inlined_call_operand.vmem [shape: f32[8,128], index: 6, kind: output, shape index: {}]  }
   0x1   :  { %62 = vset.pattern.permute.xlu1 %v63_v0  ;;  %61 = vset.pattern.permute.xlu0 %v63_v0  ;;  %v39_v1 = vld [vmem:[%s120_s4] sm:$0xff] }
   0x2   :  { %v24_v2 = vld [vmem:[%s121_s2] sm:$0xff]  ;;  %42 = vperm.xlu1 %62, %v39_v1  }
   0x3   :  { %27 = vperm.xlu0 %61, %v24_v2   ;;  %v47_v3 = vld [vmem:[%s122_s5] sm:$0xff] }
   0x4   :  { %v31_v4 = vld [vmem:[%s123_s3] sm:$0xff] }
   0x5   :  { %v23_v7 = vld [vmem:[%s124_s0] sm:$0xff] }
   0x6   :  { %v38_v8 = vld [vmem:[%s125_s1] sm:$0xff] }
   0xa   :  { %50 = vperm.xlu1 %62, %v47_v3  }
   0xb   :  { %34 = vperm.xlu0 %61, %v31_v4  }
  0x74   :  { %v43_v6 = vpop.permute.xlu1 %42 }
  0x75   :  { %v28_v5 = vpop.permute.xlu0 %27  ;;  %v45_v11 = vmul.f32 %v43_v6, %v38_v8 }
  0x76   :  { %v30_v9 = vmul.f32 %v28_v5, %v23_v7 }
  0x7c   :  { %v51_v14 = vpop.permute.xlu1 %50 }
  0x7d   :  { %v35_v10 = vpop.permute.xlu0 %34 }
  0x7e   :  { %v37_v12 = vadd.f32 %v35_v10, %v30_v9 }
  0x80   :  { %v46_v13 = vadd.f32 %v45_v11, %v37_v12 }
  0x82   :  { %v53_v15 = vadd.f32 %v51_v14, %v46_v13 }
  0x84   :  { %v54_v16 = vmax.f32 %v53_v15, 0.0 }
  0x86   :  { %55 = vst [vmem:[%s126_s6] sm:$0xff] %v54_v16 }

// kernel: resblock_forward.4
= control target key start
LH: loop header
LB: loop body
LE: loop exit
PB: predicated region body
PF: predicated region fallthrough
CT: control target
= control target key end

     0   :  { %v81_v0 = vmov 0   ;;  %vm36_vm0 = vcmask 64512   ;;  %vm63_vm1 = vcmask 7168   ;;  %vm68_vm2 = vcmask 15368   ;;  %s133_s2 = inlined_call_operand.vmem [shape: f32[8,1], index: 2, kind: input, shape index: {}]   ;;  %s134_s3 = inlined_call_operand.vmem [shape: f32[8,1], index: 3, kind: input, shape index: {}]   ;;  %s135_s0 = inlined_call_operand.vmem [shape: f32[8,128], index: 0, kind: input, shape index: {}]   ;;  %s136_s1 = inlined_call_operand.vmem [shape: f32[8,8], index: 1, kind: input, shape index: {}]   ;;  %s137_s4 = inlined_call_operand.vmem [shape: f32[8,128], index: 4, kind: output, shape index: {0}]   ;;  %s138_s5 = inlined_call_operand.vmem [shape: f32[1,8,2], index: 5, kind: output, shape index: {1}]  }
   0x1   :  { %80 = vset.pattern.permute.xlu0 %v81_v0  ;;  %v20_v1 = vld [vmem:[%s133_s2] sm:$0xff] }
   0x2   :  { %23 = vperm.xlu0 %80, %v20_v1   ;;  %v27_v2 = vld [vmem:[%s134_s3] sm:$0xff] }
   0x3   :  { %v19_v4 = vld [vmem:[%s135_s0] sm:$0xff] }
   0x4   :  { %v35_v9 = vld [vmem:[%s136_s1] sm:$0xff] }
   0xa   :  { %30 = vperm.xlu0 %80, %v27_v2  }
  0x74   :  { %v24_v3 = vpop.permute.xlu0 %23 }
  0x75   :  { %v26_v5 = vmul.f32 %v24_v3, %v19_v4 }
  0x7c   :  { %v31_v6 = vpop.permute.xlu0 %30 }
  0x7d   :  { %v33_v7 = vadd.f32 %v31_v6, %v26_v5 }
  0x7f   :  { %v34_v8 = vmax.f32 %v33_v7, 0.0 }
  0x81   :  { %55 = vmatpush.msra.mxu0 %v34_v8 }
  0x82   :  { %78 = vmatmul.msk.f32.vlgmr.msra.gmra.mxu0 %vm36_vm0, %v35_v9 }
  0xff   :  { %v57_v10 = vpop.f32.mrf.mxu0 }
 0x100   :  { %60 = vst [vmem:[%s137_s4] sm:$0xff] %v57_v10  ;;  %61 = vadd.xlane.f32.xlu1 %v57_v10  ;;  %v65_v11 = vmul.f32 %v57_v10, %v57_v10 }
 0x108   :  { %66 = vadd.xlane.f32.xlu1 %v65_v11 }
 0x173   :  { %v62_v12 = vpop.xlane.xlu1 %61 }
 0x174   :  { %64 = vst.msk [vmem:[%s138_s5] sm:$0xff] %vm63_vm1, %v62_v12 }
 0x17b   :  { %v67_v13 = vpop.xlane.xlu1 %66 }
 0x17c   :  { %69 = vst.msk [vmem:[%s138_s5] sm:$0xff] %vm68_vm2, %v67_v13 }

</bundles_post_ra>
